<compile_context>
chip_gen: v5e
topology: v5e:2x2
jax: 0.10.0
libtpu: 0.0.40
codegen_flags: <defaults>
</compile_context>

<pallas_src>
import jax
import jax.numpy as jnp
from jax.experimental import pallas as pl
from jax.experimental.pallas import tpu as pltpu

PAD = 128      # padded feature / lane width
OUT_DIM = 3    # real number of classes
N_LAYERS = 4


def mlp_kernel(x_ref, w_ref, b_ref, o_ref):
    x = x_ref[...]                                   # (TM, 128) f32

    h = jnp.dot(x, w_ref[0], preferred_element_type=jnp.float32) + b_ref[0:1, :]
    h = jnp.maximum(h, 0.0)

    h = jnp.dot(h, w_ref[1], preferred_element_type=jnp.float32) + b_ref[1:2, :]
    h = jnp.maximum(h, 0.0)

    h = jnp.dot(h, w_ref[2], preferred_element_type=jnp.float32) + b_ref[2:3, :]
    h = jnp.maximum(h, 0.0)

    logits = jnp.dot(h, w_ref[3], preferred_element_type=jnp.float32) + b_ref[3:4, :]

    # Mask padded lanes (>= OUT_DIM) to -inf so they contribute exp(.)=0 to softmax.
    lane = jax.lax.broadcasted_iota(jnp.int32, logits.shape, dimension=1)
    logits = jnp.where(lane < OUT_DIM, logits, -jnp.inf)

    # Softmax over the last axis (== PyTorch dim=1 on a (B, features) tensor).
    m = jnp.max(logits, axis=-1, keepdims=True)
    e = jnp.exp(logits - m)
    denom = jnp.sum(e, axis=-1, keepdims=True)
    o_ref[...] = (e * pl.reciprocal(denom, approx=True)).astype(o_ref.dtype)


def _round_up(n, m):
    return ((n + m - 1) // m) * m


def mlp_forward(x, w_slab, b_slab, *, tm=512):
    """x: (B, input_dim) f32. w_slab: (4,128,128). b_slab: (4,128). Returns (B, 3)."""
    B, in_dim = x.shape
    # Large batch tile to amortize per-step overhead; clamp for small batches
    # (second-to-last block dim must stay a multiple of 8).
    TM = min(tm, max(8, _round_up(B, 8)))
    B_pad = _round_up(B, TM)

    x_pad = jnp.zeros((B_pad, PAD), jnp.float32).at[:B, :in_dim].set(x)

    out = pl.pallas_call(
        mlp_kernel,
        out_shape=jax.ShapeDtypeStruct((B_pad, PAD), jnp.float32),
        grid=(B_pad // TM,),
        in_specs=[
            pl.BlockSpec((TM, PAD), lambda i: (i, 0)),          # batch tile of x
            pl.BlockSpec((N_LAYERS, PAD, PAD), lambda i: (0, 0, 0)),  # resident weights
            pl.BlockSpec((N_LAYERS, PAD), lambda i: (0, 0)),          # resident biases
        ],
        out_specs=pl.BlockSpec((TM, PAD), lambda i: (i, 0)),
        compiler_params=pltpu.CompilerParams(
            dimension_semantics=("parallel",),
        ),
    )(x_pad, w_slab, b_slab)

    return out[:B, :OUT_DIM]


def init_params(key, input_dim):
    """Deterministic init mimicking nn.Linear's U(-1/sqrt(fan_in), 1/sqrt(fan_in)).
    Weights stored as (in, out) so y = x @ W + b."""
    dims = [(input_dim, 30), (30, 30), (30, 30), (30, OUT_DIM)]
    params = []
    for (fan_in, fan_out) in dims:
        key, kw, kb = jax.random.split(key, 3)
        bound = 1.0 / jnp.sqrt(jnp.float32(fan_in))
        w = jax.random.uniform(kw, (fan_in, fan_out), jnp.float32, -bound, bound)
        b = jax.random.uniform(kb, (fan_out,), jnp.float32, -bound, bound)
        params.append((w, b))
    return params


def pack_params(params):
    """Zero-pad and pack the 4 (w, b) pairs into two slabs (2 DMAs instead of 8)."""
    w_slab = jnp.zeros((N_LAYERS, PAD, PAD), jnp.float32)
    b_slab = jnp.zeros((N_LAYERS, PAD), jnp.float32)
    for i, (w, b) in enumerate(params):
        w_slab = w_slab.at[i, :w.shape[0], :w.shape[1]].set(w)
        b_slab = b_slab.at[i, :b.shape[0]].set(b)
    return w_slab, b_slab


def ref_forward(x, params):
    h = x
    for i, (w, b) in enumerate(params):
        h = h @ w + b
        if i < len(params) - 1:
            h = jnp.maximum(h, 0.0)
    return jax.nn.softmax(h, axis=1)


if __name__ == "__main__":
    key = jax.random.PRNGKey(0)
    key, kx = jax.random.split(key)

    input_dim = 4   # iris features
    batch = 8
    x = jax.random.normal(kx, (batch, input_dim), jnp.float32)

    params = init_params(key, input_dim)
    w_slab, b_slab = pack_params(params)

    out = mlp_forward(x, w_slab, b_slab)
    out = jax.block_until_ready(out)

    # sanity: shape, softmax rows sum to ~1, matches pure-JAX reference
    assert out.shape == (batch, OUT_DIM)
    assert jnp.allclose(jnp.sum(out, axis=1), 1.0, atol=1e-2)
    ref = ref_forward(x, params)
    assert jnp.allclose(out, ref, atol=1e-2)

    print("KERNEL_OK")
</pallas_src>

<mosaic_0001>
module attributes {stable_mosaic.version = 11 : i64} {
  func.func @mlp_kernel(%arg0: i32, %arg1: memref<8x128xf32, #tpu.memory_space<vmem>>, %arg2: memref<4x128x128xf32, #tpu.memory_space<vmem>>, %arg3: memref<4x128xf32, #tpu.memory_space<vmem>>, %arg4: memref<8x128xf32, #tpu.memory_space<vmem>>) attributes {dimension_semantics = [#tpu.dimension_semantics<parallel>], iteration_bounds = array<i64: 1>, scalar_prefetch = 0 : i64, scratch_operands = 0 : i64, tpu.core_type = #tpu.core_type<tc>, window_params = [{transform_indices = @transform_0, window_bounds = array<i64: 8, 128>}, {pipeline_mode = #tpu.pipeline_mode<synchronous>, transform_indices = @transform_1, window_bounds = array<i64: 4, 128, 128>}, {pipeline_mode = #tpu.pipeline_mode<synchronous>, transform_indices = @transform_2, window_bounds = array<i64: 4, 128>}, {transform_indices = @transform_3, window_bounds = array<i64: 8, 128>}]} {
    %c0 = arith.constant 0 : index
    %c0_0 = arith.constant 0 : index
    %0 = vector.load %arg1[%c0, %c0_0] : memref<8x128xf32, #tpu.memory_space<vmem>>, vector<8x128xf32>
    %c0_1 = arith.constant 0 : index
    %c0_2 = arith.constant 0 : index
    %c0_3 = arith.constant 0 : index
    %1 = vector.load %arg2[%c0_1, %c0_2, %c0_3] : memref<4x128x128xf32, #tpu.memory_space<vmem>>, vector<1x128x128xf32>
    %2 = vector.shape_cast %1 : vector<1x128x128xf32> to vector<128x128xf32>
    %cst = arith.constant dense<0.000000e+00> : vector<8x128xf32>
    %3 = tpu.matmul %0, %2, %cst {dimension_numbers = #tpu.dot_dimension_numbers<[1], [0], [0], [1], [0, 0, 1, 1], [], []>} : vector<8x128xf32>, vector<128x128xf32>, vector<8x128xf32> -> vector<8x128xf32>
    %c0_4 = arith.constant 0 : index
    %c0_5 = arith.constant 0 : index
    %4 = vector.load %arg3[%c0_4, %c0_5] : memref<4x128xf32, #tpu.memory_space<vmem>>, vector<1x128xf32>
    %5 = vector.broadcast %4 : vector<1x128xf32> to vector<8x128xf32>
    %6 = arith.addf %3, %5 : vector<8x128xf32>
    %cst_6 = arith.constant 0.000000e+00 : f32
    %7 = vector.broadcast %cst_6 : f32 to vector<8x128xf32>
    %8 = arith.maximumf %6, %7 : vector<8x128xf32>
    %c1 = arith.constant 1 : index
    %c0_7 = arith.constant 0 : index
    %c0_8 = arith.constant 0 : index
    %9 = vector.load %arg2[%c1, %c0_7, %c0_8] : memref<4x128x128xf32, #tpu.memory_space<vmem>>, vector<1x128x128xf32>
    %10 = vector.shape_cast %9 : vector<1x128x128xf32> to vector<128x128xf32>
    %cst_9 = arith.constant dense<0.000000e+00> : vector<8x128xf32>
    %11 = tpu.matmul %8, %10, %cst_9 {dimension_numbers = #tpu.dot_dimension_numbers<[1], [0], [0], [1], [0, 0, 1, 1], [], []>} : vector<8x128xf32>, vector<128x128xf32>, vector<8x128xf32> -> vector<8x128xf32>
    %c1_10 = arith.constant 1 : index
    %c0_11 = arith.constant 0 : index
    %12 = vector.load %arg3[%c1_10, %c0_11] : memref<4x128xf32, #tpu.memory_space<vmem>>, vector<1x128xf32>
    %13 = vector.broadcast %12 : vector<1x128xf32> to vector<8x128xf32>
    %14 = arith.addf %11, %13 : vector<8x128xf32>
    %cst_12 = arith.constant 0.000000e+00 : f32
    %15 = vector.broadcast %cst_12 : f32 to vector<8x128xf32>
    %16 = arith.maximumf %14, %15 : vector<8x128xf32>
    %c2 = arith.constant 2 : index
    %c0_13 = arith.constant 0 : index
    %c0_14 = arith.constant 0 : index
    %17 = vector.load %arg2[%c2, %c0_13, %c0_14] : memref<4x128x128xf32, #tpu.memory_space<vmem>>, vector<1x128x128xf32>
    %18 = vector.shape_cast %17 : vector<1x128x128xf32> to vector<128x128xf32>
    %cst_15 = arith.constant dense<0.000000e+00> : vector<8x128xf32>
    %19 = tpu.matmul %16, %18, %cst_15 {dimension_numbers = #tpu.dot_dimension_numbers<[1], [0], [0], [1], [0, 0, 1, 1], [], []>} : vector<8x128xf32>, vector<128x128xf32>, vector<8x128xf32> -> vector<8x128xf32>
    %c2_16 = arith.constant 2 : index
    %c0_17 = arith.constant 0 : index
    %20 = vector.load %arg3[%c2_16, %c0_17] : memref<4x128xf32, #tpu.memory_space<vmem>>, vector<1x128xf32>
    %21 = vector.broadcast %20 : vector<1x128xf32> to vector<8x128xf32>
    %22 = arith.addf %19, %21 : vector<8x128xf32>
    %cst_18 = arith.constant 0.000000e+00 : f32
    %23 = vector.broadcast %cst_18 : f32 to vector<8x128xf32>
    %24 = arith.maximumf %22, %23 : vector<8x128xf32>
    %c3 = arith.constant 3 : index
    %c0_19 = arith.constant 0 : index
    %c0_20 = arith.constant 0 : index
    %25 = vector.load %arg2[%c3, %c0_19, %c0_20] : memref<4x128x128xf32, #tpu.memory_space<vmem>>, vector<1x128x128xf32>
    %26 = vector.shape_cast %25 : vector<1x128x128xf32> to vector<128x128xf32>
    %cst_21 = arith.constant dense<0.000000e+00> : vector<8x128xf32>
    %27 = tpu.matmul %24, %26, %cst_21 {dimension_numbers = #tpu.dot_dimension_numbers<[1], [0], [0], [1], [0, 0, 1, 1], [], []>} : vector<8x128xf32>, vector<128x128xf32>, vector<8x128xf32> -> vector<8x128xf32>
    %c3_22 = arith.constant 3 : index
    %c0_23 = arith.constant 0 : index
    %28 = vector.load %arg3[%c3_22, %c0_23] : memref<4x128xf32, #tpu.memory_space<vmem>>, vector<1x128xf32>
    %29 = vector.broadcast %28 : vector<1x128xf32> to vector<8x128xf32>
    %30 = arith.addf %27, %29 : vector<8x128xf32>
    %31 = tpu.iota {dimensions = array<i32: 1>} : vector<8x128xi32>
    %c3_i32 = arith.constant 3 : i32
    %32 = vector.broadcast %c3_i32 : i32 to vector<8x128xi32>
    %33 = arith.cmpi slt, %31, %32 : vector<8x128xi32>
    %cst_24 = arith.constant 0xFF800000 : f32
    %34 = vector.broadcast %cst_24 : f32 to vector<8x128xf32>
    %35 = arith.select %33, %30, %34 : vector<8x128xi1>, vector<8x128xf32>
    %cst_25 = arith.constant dense<0xFF800000> : vector<8xf32>
    %36 = vector.multi_reduction <maximumf>, %35, %cst_25 [1] : vector<8x128xf32> to vector<8xf32>
    %37 = vector.shape_cast %36 : vector<8xf32> to vector<8x1xf32>
    %38 = vector.broadcast %37 : vector<8x1xf32> to vector<8x128xf32>
    %39 = arith.subf %35, %38 : vector<8x128xf32>
    %40 = math.exp %39 : vector<8x128xf32>
    %cst_26 = arith.constant dense<0.000000e+00> : vector<8xf32>
    %41 = vector.multi_reduction <add>, %40, %cst_26 [1] : vector<8x128xf32> to vector<8xf32>
    %42 = vector.shape_cast %41 : vector<8xf32> to vector<8x1xf32>
    %43 = tpu.reciprocal %42 {approx = true} : vector<8x1xf32> -> vector<8x1xf32>
    %44 = vector.broadcast %43 : vector<8x1xf32> to vector<8x128xf32>
    %45 = arith.mulf %40, %44 : vector<8x128xf32>
    %c0_27 = arith.constant 0 : index
    %c0_28 = arith.constant 0 : index
    %46 = vector.load %arg4[%c0_27, %c0_28] : memref<8x128xf32, #tpu.memory_space<vmem>>, vector<8x128xf32>
    tpu.vector_store %arg4[%c0_27, %c0_28], %45 {strides = array<i32>} : memref<8x128xf32, #tpu.memory_space<vmem>>, vector<8x128xf32>,
    return
  }
  func.func @transform_0(%arg0: i32) -> (i32, i32) {
    %c0_i32 = arith.constant 0 : i32
    %c0_i32_0 = arith.constant 0 : i32
    return %arg0, %c0_i32 : i32, i32
  }
  func.func @transform_1(%arg0: i32) -> (i32, i32, i32) {
    %c0_i32 = arith.constant 0 : i32
    %c0_i32_0 = arith.constant 0 : i32
    %c0_i32_1 = arith.constant 0 : i32
    %c0_i32_2 = arith.constant 0 : i32
    return %c0_i32, %c0_i32_0, %c0_i32_1 : i32, i32, i32
  }
  func.func @transform_2(%arg0: i32) -> (i32, i32) {
    %c0_i32 = arith.constant 0 : i32
    %c0_i32_0 = arith.constant 0 : i32
    %c0_i32_1 = arith.constant 0 : i32
    return %c0_i32, %c0_i32_0 : i32, i32
  }
  func.func @transform_3(%arg0: i32) -> (i32, i32) {
    %c0_i32 = arith.constant 0 : i32
    %c0_i32_0 = arith.constant 0 : i32
    return %arg0, %c0_i32 : i32, i32
  }
}

</mosaic_0001>

<bundles_post_ra>
// kernel: tpu_custom_call.1
= control target key start
LH: loop header
LB: loop body
LE: loop exit
PB: predicated region body
PF: predicated region fallthrough
CT: control target
= control target key end

     0   :  { %8 = vsyncpa [#allocation3], 0  ;;  %s403_s0 = inlined_call_operand.hbm [shape: f32[8,128], index: 0, kind: input, shape index: {}]   ;;  %s404_s1 = inlined_call_operand.hbm [shape: f32[4,128,128], index: 1, kind: input, shape index: {}]   ;;  %s405_s2 = inlined_call_operand.hbm [shape: f32[4,128], index: 2, kind: input, shape index: {}]   ;;  %s406_s3 = inlined_call_operand.hbm [shape: f32[8,128], index: 3, kind: output, shape index: {}]  }
   0x1   :  { %9 = vsyncpa [#allocation6], 0  ;;  %s26_s14 = sshll.u32 %s404_s1, 4  ;;  %s27_s14 = int_to_ptr.hbm [resolvable:$true] %s26_s14 }
   0x2   :  { %10 = vsyncpa [#allocation4], 0  ;;  %s365_s15 = smov [#allocation5]   ;;  %s16_s19 = sshll.u32 %s403_s0, 4  ;;  %s17_s19 = int_to_ptr.hbm [resolvable:$true] %s16_s19 }
   0x3   :  { %s28_s16 = sshll.u32 %s365_s15, 4  ;;  %s366_s20 = smov 128   ;;  %s29_s16 = int_to_ptr.vmem [resolvable:$true] %s28_s16 }
   0x4   :  { %s367_s21 = smov 8   ;;  %s368_s22 = smov [#allocation2]  }
   0x5   :  { %34 = dma.hbm_to_vmem [thread:$0]  %s27_s14, 8192, %s29_s16, [#allocation6], %s366_s20, %s366_s20, %s367_s21  }
   0x6   :  { %s18_s23 = sshll.u32 %s368_s22, 4  ;;  %s40_s26 = sshll.u32 %s405_s2, 4  ;;  %s19_s23 = int_to_ptr.vmem [resolvable:$true] %s18_s23  ;;  %s41_s26 = int_to_ptr.hbm [resolvable:$true] %s40_s26 }
   0x7   :  { %21 = dma.hbm_to_vmem [thread:$0]  %s17_s19, 128, %s19_s23, [#allocation3]  }
   0x8   :  { %s369_s1 = smov [#allocation7]  }
   0x9   :  { %s42_s27 = sshll.u32 %s369_s1, 4  ;;  %s43_s27 = int_to_ptr.vmem [resolvable:$true] %s42_s27 }
   0xa   :  { %45 = dma.hbm_to_vmem [thread:$0]  %s41_s26, 64, %s43_s27, [#allocation6]  }
   0xb   :  { %359 = dma.done.wait [#allocation3], 128  }
   0xc   :  { %360 = vsyncadd [#allocation3], 4294967168 }
   0xd   :  { %361 = dma.done.wait [#allocation6], 8256  }
   0xe   :  { %362 = vsyncadd [#allocation6], 4294959040  ;;  %v74_v0 = vld [vmem:[#allocation5 + $0x78] sm:$0xff]  ;;  %v73_v1 = vld [vmem:[#allocation5 + $0x70] sm:$0xff]  ;;  %s370_s0 = smov [#allocation8]   ;;  %s238_s30 = sshll.u32 %s406_s3, 4  ;;  %s239_s30 = int_to_ptr.hbm [resolvable:$true] %s238_s30 }
   0xf   :  { %77 = vmatpush.msra.mxu0 %v74_v0  ;;  %v72_v2 = vld [vmem:[#allocation5 + $0x68] sm:$0xff]  ;;  %v71_v3 = vld [vmem:[#allocation5 + $0x60] sm:$0xff]  ;;  %v114_v4 = vld [vmem:[#allocation5 + $0xf8] sm:$0xff]  ;;  %s236_s2 = sshll.u32 %s370_s0, 4  ;;  %s237_s2 = int_to_ptr.vmem [resolvable:$true] %s236_s2 }
  0x10   :  { %v70_v5 = vld [vmem:[#allocation5 + $0x58] sm:$0xff]  ;;  %117 = vmatpush.msra.mxu1 %v114_v4  ;;  %v113_v6 = vld [vmem:[#allocation5 + $0xf0] sm:$0xff]  ;;  %v112_v7 = vld [vmem:[#allocation5 + $0xe8] sm:$0xff] }
  0x11   :  { %78 = vmatpush.msra.mxu0 %v73_v1  ;;  %v69_v8 = vld [vmem:[#allocation5 + $0x50] sm:$0xff]  ;;  %v111_v9 = vld [vmem:[#allocation5 + $0xe0] sm:$0xff]  ;;  %v68_v10 = vld [vmem:[#allocation5 + $0x48] sm:$0xff] }
  0x12   :  { %118 = vmatpush.msra.mxu1 %v113_v6  ;;  %v110_v11 = vld [vmem:[#allocation5 + $0xd8] sm:$0xff]  ;;  %v67_v12 = vld [vmem:[#allocation5 + $0x40] sm:$0xff]  ;;  %v109_v13 = vld [vmem:[#allocation5 + $0xd0] sm:$0xff] }
  0x13   :  { %79 = vmatpush.msra.mxu0 %v72_v2  ;;  %v66_v14 = vld [vmem:[#allocation5 + $0x38] sm:$0xff]  ;;  %v108_v15 = vld [vmem:[#allocation5 + $0xc8] sm:$0xff]  ;;  %v65_v16 = vld [vmem:[#allocation5 + $0x30] sm:$0xff] }
  0x14   :  { %119 = vmatpush.msra.mxu1 %v112_v7  ;;  %v107_v17 = vld [vmem:[#allocation5 + $0xc0] sm:$0xff]  ;;  %v64_v18 = vld [vmem:[#allocation5 + $0x28] sm:$0xff]  ;;  %v106_v19 = vld [vmem:[#allocation5 + $0xb8] sm:$0xff] }
  0x15   :  { %80 = vmatpush.msra.mxu0 %v71_v3  ;;  %v63_v20 = vld [vmem:[#allocation5 + $0x20] sm:$0xff]  ;;  %v105_v21 = vld [vmem:[#allocation5 + $0xb0] sm:$0xff]  ;;  %v62_v22 = vld [vmem:[#allocation5 + $0x18] sm:$0xff] }
  0x16   :  { %120 = vmatpush.msra.mxu1 %v111_v9  ;;  %v104_v23 = vld [vmem:[#allocation5 + $0xa8] sm:$0xff]  ;;  %v61_v24 = vld [vmem:[#allocation5 + $0x10] sm:$0xff]  ;;  %v103_v25 = vld [vmem:[#allocation5 + $0xa0] sm:$0xff] }
  0x17   :  { %81 = vmatpush.msra.mxu0 %v70_v5  ;;  %v60_v26 = vld [vmem:[#allocation5 + $0x8] sm:$0xff]  ;;  %v102_v27 = vld [vmem:[#allocation5 + $0x98] sm:$0xff]  ;;  %v59_v28 = vld [vmem:[#allocation5] sm:$0xff] }
  0x18   :  { %121 = vmatpush.msra.mxu1 %v110_v11  ;;  %v58_v29 = vld [vmem:[#allocation2] sm:$0xff]  ;;  %v101_v30 = vld [vmem:[#allocation5 + $0x90] sm:$0xff]  ;;  %v100_v31 = vld [vmem:[#allocation5 + $0x88] sm:$0xff] }
  0x19   :  { %82 = vmatpush.msra.mxu0 %v69_v8  ;;  %v99_v32 = vld [vmem:[#allocation5 + $0x80] sm:$0xff]  ;;  %v154_v33 = vld [vmem:[#allocation5 + $0x178] sm:$0xff]  ;;  %v153_v34 = vld [vmem:[#allocation5 + $0x170] sm:$0xff] }
  0x1a   :  { %122 = vmatpush.msra.mxu1 %v109_v13  ;;  %157 = vmatpush.msra.mxu2 %v154_v33  ;;  %v152_v35 = vld [vmem:[#allocation5 + $0x168] sm:$0xff]  ;;  %v151_v36 = vld [vmem:[#allocation5 + $0x160] sm:$0xff]  ;;  %v150_v37 = vld [vmem:[#allocation5 + $0x158] sm:$0xff]  ;;  %v217_v13 = vlaneseq }
  0x1b   :  { %83 = vmatpush.msra.mxu0 %v68_v10  ;;  %v149_v38 = vld [vmem:[#allocation5 + $0x150] sm:$0xff]  ;;  %v148_v39 = vld [vmem:[#allocation5 + $0x148] sm:$0xff]  ;;  %v147_v40 = vld [vmem:[#allocation5 + $0x140] sm:$0xff] }
  0x1c   :  { %123 = vmatpush.msra.mxu1 %v108_v15  ;;  %158 = vmatpush.msra.mxu2 %v153_v34  ;;  %v146_v41 = vld [vmem:[#allocation5 + $0x138] sm:$0xff]  ;;  %v145_v42 = vld [vmem:[#allocation5 + $0x130] sm:$0xff]  ;;  %v144_v43 = vld [vmem:[#allocation5 + $0x128] sm:$0xff] }
  0x1d   :  { %84 = vmatpush.msra.mxu0 %v67_v12  ;;  %v143_v44 = vld [vmem:[#allocation5 + $0x120] sm:$0xff]  ;;  %v142_v45 = vld [vmem:[#allocation5 + $0x118] sm:$0xff]  ;;  %v141_v50 = vld [vmem:[#allocation5 + $0x110] sm:$0xff] }
  0x1e   :  { %124 = vmatpush.msra.mxu1 %v107_v17  ;;  %159 = vmatpush.msra.mxu2 %v152_v35  ;;  %v255_v46 = vld [vmem:[#allocation7] ss:$0 sm:$0xff]  ;;  %v140_v51 = vld [vmem:[#allocation5 + $0x108] sm:$0xff]  ;;  %v194_v53 = vld [vmem:[#allocation5 + $0x1f8] sm:$0xff] }
  0x1f   :  { %85 = vmatpush.msra.mxu0 %v66_v14  ;;  %v139_v52 = vld [vmem:[#allocation5 + $0x100] sm:$0xff]  ;;  %v193_v54 = vld [vmem:[#allocation5 + $0x1f0] sm:$0xff]  ;;  %197 = vmatpush.msra.mxu3 %v194_v53  ;;  %v192_v55 = vld [vmem:[#allocation5 + $0x1e8] sm:$0xff]  ;;  %v218_v14 = vand.u32 127, %v217_v13 }
  0x20   :  { %125 = vmatpush.msra.mxu1 %v106_v19  ;;  %160 = vmatpush.msra.mxu2 %v151_v36  ;;  %v191_v56 = vld [vmem:[#allocation5 + $0x1e0] sm:$0xff]  ;;  %v190_v57 = vld [vmem:[#allocation5 + $0x1d8] sm:$0xff]  ;;  %v189_v58 = vld [vmem:[#allocation5 + $0x1d0] sm:$0xff] }
  0x21   :  { %86 = vmatpush.msra.mxu0 %v65_v16  ;;  %198 = vmatpush.msra.mxu3 %v193_v54  ;;  %v188_v59 = vld [vmem:[#allocation5 + $0x1c8] sm:$0xff]  ;;  %v187_v60 = vld [vmem:[#allocation5 + $0x1c0] sm:$0xff]  ;;  %v186_v61 = vld [vmem:[#allocation5 + $0x1b8] sm:$0xff]  ;;  %vm219_vm0 = vcmp.lt.s32.totalorder %v218_v14, 3 }
  0x22   :  { %126 = vmatpush.msra.mxu1 %v105_v21  ;;  %161 = vmatpush.msra.mxu2 %v150_v37  ;;  %v185_v62 = vld [vmem:[#allocation5 + $0x1b0] sm:$0xff]  ;;  %v184_v63 = vld [vmem:[#allocation5 + $0x1a8] sm:$0xff]  ;;  %v183_v0 = vld [vmem:[#allocation5 + $0x1a0] sm:$0xff] }
  0x23   :  { %87 = vmatpush.msra.mxu0 %v64_v18  ;;  %199 = vmatpush.msra.mxu3 %v192_v55  ;;  %v182_v1 = vld [vmem:[#allocation5 + $0x198] sm:$0xff]  ;;  %v256_v2 = vld [vmem:[#allocation7 + $0x1] ss:$0 sm:$0xff]  ;;  %v181_v6 = vld [vmem:[#allocation5 + $0x190] sm:$0xff] }
  0x24   :  { %127 = vmatpush.msra.mxu1 %v104_v23  ;;  %162 = vmatpush.msra.mxu2 %v149_v38  ;;  %v180_v7 = vld [vmem:[#allocation5 + $0x188] sm:$0xff]  ;;  %v179_v8 = vld [vmem:[#allocation5 + $0x180] sm:$0xff] }
  0x25   :  { %88 = vmatpush.msra.mxu0 %v63_v20  ;;  %200 = vmatpush.msra.mxu3 %v191_v56  ;;  %v257_v9 = vld [vmem:[#allocation7 + $0x2] ss:$0 sm:$0xff]  ;;  %v258_v15 = vld [vmem:[#allocation7 + $0x3] ss:$0 sm:$0xff] }
  0x26   :  { %128 = vmatpush.msra.mxu1 %v103_v25  ;;  %163 = vmatpush.msra.mxu2 %v148_v39 }
  0x27   :  { %89 = vmatpush.msra.mxu0 %v62_v22  ;;  %201 = vmatpush.msra.mxu3 %v190_v57 }
  0x28   :  { %129 = vmatpush.msra.mxu1 %v102_v27  ;;  %164 = vmatpush.msra.mxu2 %v147_v40 }
  0x29   :  { %90 = vmatpush.msra.mxu0 %v61_v24  ;;  %202 = vmatpush.msra.mxu3 %v189_v58 }
  0x2a   :  { %130 = vmatpush.msra.mxu1 %v101_v30  ;;  %165 = vmatpush.msra.mxu2 %v146_v41 }
  0x2b   :  { %91 = vmatpush.msra.mxu0 %v60_v26  ;;  %203 = vmatpush.msra.mxu3 %v188_v59 }
  0x2c   :  { %131 = vmatpush.msra.mxu1 %v100_v31  ;;  %166 = vmatpush.msra.mxu2 %v145_v42 }
  0x2d   :  { %92 = vmatpush.msra.mxu0 %v59_v28  ;;  %204 = vmatpush.msra.mxu3 %v187_v60 }
  0x2e   :  { %93 = vmatmul.f32.vlgmr.msra.gmra.mxu0 %v58_v29  ;;  %132 = vmatpush.msra.mxu1 %v99_v32 }
  0x2f   :  { %167 = vmatpush.msra.mxu2 %v144_v43  ;;  %205 = vmatpush.msra.mxu3 %v186_v61 }
  0x31   :  { %168 = vmatpush.msra.mxu2 %v143_v44  ;;  %206 = vmatpush.msra.mxu3 %v185_v62 }
  0x33   :  { %169 = vmatpush.msra.mxu2 %v142_v45  ;;  %207 = vmatpush.msra.mxu3 %v184_v63 }
  0x35   :  { %170 = vmatpush.msra.mxu2 %v141_v50  ;;  %208 = vmatpush.msra.mxu3 %v183_v0 }
  0x37   :  { %171 = vmatpush.msra.mxu2 %v140_v51  ;;  %209 = vmatpush.msra.mxu3 %v182_v1 }
  0x39   :  { %172 = vmatpush.msra.mxu2 %v139_v52  ;;  %210 = vmatpush.msra.mxu3 %v181_v6 }
  0x3b   :  { %211 = vmatpush.msra.mxu3 %v180_v7 }
  0x3d   :  { %212 = vmatpush.msra.mxu3 %v179_v8 }
  0xab   :  { %v94_v47 = vpop.f32.mrf.mxu0 }
  0xac   :  { %v95_v48 = vadd.f32 %v255_v46, %v94_v47 }
  0xae   :  { %v97_v49 = vmax.f32 %v95_v48, 0.0 }
  0xb0   :  { %133 = vmatmul.f32.vlgmr.msra.gmra.mxu1 %v97_v49 }
 0x12d   :  { %v134_v3 = vpop.f32.mrf.mxu1 }
 0x12e   :  { %v135_v4 = vadd.f32 %v256_v2, %v134_v3 }
 0x130   :  { %v137_v5 = vmax.f32 %v135_v4, 0.0 }
 0x132   :  { %173 = vmatmul.f32.vlgmr.msra.gmra.mxu2 %v137_v5 }
 0x1b5   :  { %v174_v10 = vpop.f32.mrf.mxu2 }
 0x1b6   :  { %v175_v11 = vadd.f32 %v257_v9, %v174_v10 }
 0x1b8   :  { %v177_v12 = vmax.f32 %v175_v11, 0.0 }
 0x1ba   :  { %213 = vmatmul.f32.vlgmr.msra.gmra.mxu3 %v177_v12 }
 0x23d   :  { %v214_v16 = vpop.f32.mrf.mxu3 }
 0x23e   :  { %v215_v17 = vadd.f32 %v258_v15, %v214_v16 }
 0x240   :  { %v220_v18 = vsel %vm219_vm0, %v215_v17, -inf }
 0x241   :  { %221 = vmax.xlane.f32.xlu0 %v220_v18 }
 0x2b4   :  { %v222_v19 = vpop.xlane.xlu0 %221 }
 0x2b5   :  { %v223_v20 = vsub.f32 %v220_v18, %v222_v19 }
 0x2b7   :  { %v224_v21 = vmul.f32 1.442695, %v223_v20 }
 0x2b9   :  { %259 = vpow2.f32 %v224_v21 }
 0x2bf   :  { %v260_v22 = vpop.eup %259 }
 0x2c0   :  { %226 = vadd.xlane.f32.xlu0 %v260_v22 }
 0x333   :  { %v227_v23 = vpop.xlane.xlu0 %226 }
 0x334   :  { %261 = vrcp.f32 %v227_v23 }
 0x33a   :  { %v262_v24 = vpop.eup %261 }
 0x33b   :  { %v229_v25 = vmul.f32 %v262_v24, %v260_v22 }
 0x33d   :  { %230 = vst [vmem:[#allocation8] sm:$0xff] %v229_v25 }
 0x33e   :  { %241 = dma.vmem_to_hbm [thread:$0]  %s237_s2, 128, %s239_s30, [#allocation4]  }
 0x33f   :  { %363 = dma.done.wait [#allocation4], 128  }
 0x340   :  { %364 = vsyncadd [#allocation4], 4294967168 }
 0x341   :  { %246 = vsyncpa [#allocation3], 1 }
 0x342   :  { %247 = vsyncpa [#allocation6], 1 }
 0x343   :  { %248 = vsyncpa [#allocation4], 1 }

</bundles_post_ra>
